<compile_context>
chip_gen: v6e
topology: v6e:2x2x1
jax: 0.10.0
libtpu: 0.0.40
codegen_flags: <defaults>
</compile_context>

<pallas_src>
import functools

import jax
import jax.numpy as jnp
from jax import lax
from jax.experimental import pallas as pl
from jax.experimental.pallas import tpu as pltpu

LANES = 128
TILE_ROWS = 1024  # (1024, 128) f32 block = 512 KiB/input/buffer; 2 MiB total
                  # with double buffering -> safe on v5e/v6e/v7x VMEM budgets.


def _sublane_pack(dtype):
    # Minimum sublane multiple for the dtype's packing (f32: 8, bf16: 16, i8: 32).
    return {4: 8, 2: 16, 1: 32}.get(jnp.dtype(dtype).itemsize, 8)


def _iou_kernel(x_ref, t_ref, inter_ref, total_ref, *, valid_rows, block_rows):
    i = pl.program_id(0)

    @pl.when(i == 0)
    def _():
        inter_ref[...] = jnp.zeros_like(inter_ref)
        total_ref[...] = jnp.zeros_like(total_ref)

    x = x_ref[...].astype(jnp.float32)
    t = t_ref[...].astype(jnp.float32)

    if valid_rows % block_rows != 0:
        # Last block reaches past the real data; Pallas edge padding is
        # unspecified, so zero those rows before accumulating.
        row_idx = i * block_rows + lax.broadcasted_iota(
            jnp.int32, (block_rows, LANES), 0
        )
        keep = row_idx < valid_rows
        x = jnp.where(keep, x, 0.0)
        t = jnp.where(keep, t, 0.0)

    # Per-step partials stay in vector registers / VMEM (no SMEM scalar RMW
    # on the critical path): a sublane reduce into the (1, 128) accumulators.
    inter_ref[...] += jnp.sum(x * t, axis=0, keepdims=True)
    total_ref[...] += jnp.sum(x + t, axis=0, keepdims=True)


def iou(inputs, targets, smooth=1e-6):
    """Pallas TPU implementation of the PyTorch IoU module's forward pass."""
    assert inputs.shape == targets.shape

    # Stream in native dtype (upcast inside the kernel) -- avoids an extra
    # HBM pass and halves traffic for bf16 inputs.
    x = inputs.reshape(-1)
    t = targets.reshape(-1)
    n = x.shape[0]

    # Minimal zero-pad to a sublane-aligned row count (zeros are benign for
    # both sums).  No padding at all when the size is already aligned.
    # TODO(synk): handle the unaligned-tail case fully in-kernel (lane mask on
    # the last 128-wide row) to avoid even this small pad copy.
    pack = max(_sublane_pack(x.dtype), _sublane_pack(t.dtype))
    chunk = pack * LANES
    n_pad = pl.cdiv(n, chunk) * chunk
    if n_pad != n:
        x = jnp.pad(x, (0, n_pad - n))
        t = jnp.pad(t, (0, n_pad - n))

    rows = n_pad // LANES
    block_rows = min(TILE_ROWS, rows)  # rows is a multiple of `pack`
    x2 = x.reshape(rows, LANES)
    t2 = t.reshape(rows, LANES)
    grid = (pl.cdiv(rows, block_rows),)

    kernel = functools.partial(
        _iou_kernel, valid_rows=rows, block_rows=block_rows
    )

    # TODO(synk): on v7x, add a leading size-2 "parallel" grid axis with
    # per-core partial-sum output rows to use both TensorCores.
    inter_part, total_part = pl.pallas_call(
        kernel,
        out_shape=(
            jax.ShapeDtypeStruct((1, LANES), jnp.float32),
            jax.ShapeDtypeStruct((1, LANES), jnp.float32),
        ),
        grid_spec=pltpu.PrefetchScalarGridSpec(
            num_scalar_prefetch=0,
            grid=grid,
            in_specs=[
                pl.BlockSpec((block_rows, LANES), lambda i: (i, 0)),
                pl.BlockSpec((block_rows, LANES), lambda i: (i, 0)),
            ],
            out_specs=[
                pl.BlockSpec((1, LANES), lambda i: (0, 0)),
                pl.BlockSpec((1, LANES), lambda i: (0, 0)),
            ],
        ),
        compiler_params=pltpu.CompilerParams(
            dimension_semantics=("arbitrary",)
        ),
    )(x2, t2)

    # Tiny epilogue in XLA: cross-lane reduce of 128 floats + scalar math.
    inter = jnp.sum(inter_part)
    total = jnp.sum(total_part)
    union = total - inter
    return (inter + smooth) / (union + smooth)


def iou_ref(inputs, targets, smooth=1e-6):
    x = inputs.reshape(-1).astype(jnp.float32)
    t = targets.reshape(-1).astype(jnp.float32)
    inter = jnp.sum(x * t)
    total = jnp.sum(x + t)
    union = total - inter
    return (inter + smooth) / (union + smooth)


if __name__ == "__main__":
    key = jax.random.PRNGKey(0)
    k1, k2 = jax.random.split(key)

    # Small NCHW shapes: sigmoid-like predictions vs binary targets.
    shape = (2, 4, 16, 16)
    inputs = jax.nn.sigmoid(jax.random.normal(k1, shape, dtype=jnp.float32))
    targets = (jax.random.uniform(k2, shape) > 0.5).astype(jnp.float32)

    result = jax.block_until_ready(iou(inputs, targets))
    expected = iou_ref(inputs, targets)
    assert jnp.allclose(result, expected, rtol=1e-5, atol=1e-6), (
        result,
        expected,
    )
    print("KERNEL_OK")
</pallas_src>

<mosaic_0001>
module attributes {stable_mosaic.version = 11 : i64} {
  func.func @_iou_kernel(%arg0: i32, %arg1: memref<16x128xf32, #tpu.memory_space<vmem>>, %arg2: memref<16x128xf32, #tpu.memory_space<vmem>>, %arg3: memref<1x128xf32, #tpu.memory_space<vmem>>, %arg4: memref<1x128xf32, #tpu.memory_space<vmem>>) attributes {dimension_semantics = [#tpu.dimension_semantics<arbitrary>], iteration_bounds = array<i64: 1>, scalar_prefetch = 0 : i64, scratch_operands = 0 : i64, tpu.core_type = #tpu.core_type<tc>, window_params = [{transform_indices = @transform_0, window_bounds = array<i64: 16, 128>}, {transform_indices = @transform_1, window_bounds = array<i64: 16, 128>}, {pipeline_mode = #tpu.pipeline_mode<synchronous>, transform_indices = @transform_2, window_bounds = array<i64: 1, 128>}, {pipeline_mode = #tpu.pipeline_mode<synchronous>, transform_indices = @transform_3, window_bounds = array<i64: 1, 128>}]} {
    %c0_i32 = arith.constant 0 : i32
    %0 = arith.cmpi eq, %arg0, %c0_i32 : i32
    %1 = arith.extui %0 : i1 to i32
    %c0_i32_0 = arith.constant 0 : i32
    %2 = arith.cmpi ne, %1, %c0_i32_0 : i32
    scf.if %2 {
      %cst_13 = arith.constant 0.000000e+00 : f32
      %17 = vector.broadcast %cst_13 : f32 to vector<1x128xf32>
      %c0_14 = arith.constant 0 : index
      %c0_15 = arith.constant 0 : index
      %18 = vector.load %arg3[%c0_14, %c0_15] : memref<1x128xf32, #tpu.memory_space<vmem>>, vector<1x128xf32>
      tpu.vector_store %arg3[%c0_14, %c0_15], %17 {strides = array<i32>} : memref<1x128xf32, #tpu.memory_space<vmem>>, vector<1x128xf32>,
      %cst_16 = arith.constant 0.000000e+00 : f32
      %19 = vector.broadcast %cst_16 : f32 to vector<1x128xf32>
      %c0_17 = arith.constant 0 : index
      %c0_18 = arith.constant 0 : index
      %20 = vector.load %arg4[%c0_17, %c0_18] : memref<1x128xf32, #tpu.memory_space<vmem>>, vector<1x128xf32>
      tpu.vector_store %arg4[%c0_17, %c0_18], %19 {strides = array<i32>} : memref<1x128xf32, #tpu.memory_space<vmem>>, vector<1x128xf32>,
    } else {
    }
    %c0 = arith.constant 0 : index
    %c0_1 = arith.constant 0 : index
    %3 = vector.load %arg1[%c0, %c0_1] : memref<16x128xf32, #tpu.memory_space<vmem>>, vector<16x128xf32>
    %c0_2 = arith.constant 0 : index
    %c0_3 = arith.constant 0 : index
    %4 = vector.load %arg2[%c0_2, %c0_3] : memref<16x128xf32, #tpu.memory_space<vmem>>, vector<16x128xf32>
    %c0_4 = arith.constant 0 : index
    %c0_5 = arith.constant 0 : index
    %5 = vector.load %arg3[%c0_4, %c0_5] : memref<1x128xf32, #tpu.memory_space<vmem>>, vector<1x128xf32>
    %6 = arith.mulf %3, %4 : vector<16x128xf32>
    %cst = arith.constant dense<0.000000e+00> : vector<128xf32>
    %7 = vector.multi_reduction <add>, %6, %cst [0] : vector<16x128xf32> to vector<128xf32>
    %8 = vector.shape_cast %7 : vector<128xf32> to vector<1x128xf32>
    %9 = arith.addf %5, %8 : vector<1x128xf32>
    %c0_6 = arith.constant 0 : index
    %c0_7 = arith.constant 0 : index
    %10 = vector.load %arg3[%c0_6, %c0_7] : memref<1x128xf32, #tpu.memory_space<vmem>>, vector<1x128xf32>
    tpu.vector_store %arg3[%c0_6, %c0_7], %9 {strides = array<i32>} : memref<1x128xf32, #tpu.memory_space<vmem>>, vector<1x128xf32>,
    %c0_8 = arith.constant 0 : index
    %c0_9 = arith.constant 0 : index
    %11 = vector.load %arg4[%c0_8, %c0_9] : memref<1x128xf32, #tpu.memory_space<vmem>>, vector<1x128xf32>
    %12 = arith.addf %3, %4 : vector<16x128xf32>
    %cst_10 = arith.constant dense<0.000000e+00> : vector<128xf32>
    %13 = vector.multi_reduction <add>, %12, %cst_10 [0] : vector<16x128xf32> to vector<128xf32>
    %14 = vector.shape_cast %13 : vector<128xf32> to vector<1x128xf32>
    %15 = arith.addf %11, %14 : vector<1x128xf32>
    %c0_11 = arith.constant 0 : index
    %c0_12 = arith.constant 0 : index
    %16 = vector.load %arg4[%c0_11, %c0_12] : memref<1x128xf32, #tpu.memory_space<vmem>>, vector<1x128xf32>
    tpu.vector_store %arg4[%c0_11, %c0_12], %15 {strides = array<i32>} : memref<1x128xf32, #tpu.memory_space<vmem>>, vector<1x128xf32>,
    return
  }
  func.func @transform_0(%arg0: i32) -> (i32, i32) {
    %c0_i32 = arith.constant 0 : i32
    %c0_i32_0 = arith.constant 0 : i32
    return %arg0, %c0_i32 : i32, i32
  }
  func.func @transform_1(%arg0: i32) -> (i32, i32) {
    %c0_i32 = arith.constant 0 : i32
    %c0_i32_0 = arith.constant 0 : i32
    return %arg0, %c0_i32 : i32, i32
  }
  func.func @transform_2(%arg0: i32) -> (i32, i32) {
    %c0_i32 = arith.constant 0 : i32
    %c0_i32_0 = arith.constant 0 : i32
    %c0_i32_1 = arith.constant 0 : i32
    return %c0_i32, %c0_i32_0 : i32, i32
  }
  func.func @transform_3(%arg0: i32) -> (i32, i32) {
    %c0_i32 = arith.constant 0 : i32
    %c0_i32_0 = arith.constant 0 : i32
    %c0_i32_1 = arith.constant 0 : i32
    return %c0_i32, %c0_i32_0 : i32, i32
  }
}

</mosaic_0001>

<bundles_post_ra>
// kernel: tpu_custom_call.1
= control target key start
LH: loop header
LB: loop body
LE: loop exit
PB: predicated region body
PF: predicated region fallthrough
CT: control target
= control target key end

     0   :  { %9 = vsyncpa [#allocation3], 0  ;;  %s241_s0 = inlined_call_operand.hbm [shape: f32[16,128], index: 0, kind: input, shape index: {}]   ;;  %s242_s1 = inlined_call_operand.hbm [shape: f32[16,128], index: 1, kind: input, shape index: {}]   ;;  %s243_s2 = inlined_call_operand.hbm [shape: f32[1,128], index: 2, kind: output, shape index: {0}]   ;;  %s244_s3 = inlined_call_operand.hbm [shape: f32[1,128], index: 3, kind: output, shape index: {1}]  }
   0x1   :  { %10 = vsyncpa [#allocation6], 0 }
   0x2   :  { %11 = vsyncpa [#allocation4], 0 }
   0x3   :  { %12 = vsyncpa [#allocation9], 0  ;;  %s202_s12 = smov [#allocation2]  }
   0x4   :  { %s18_s13 = sshll.u32 %s202_s12, 4  ;;  %s19_s13 = int_to_ptr.vmem [resolvable:$true] %s18_s13 }
   0x5   :  { %s122_s14 = scalar_lea.vmem %s19_s13, 256  ;;  %p127_p1 = scmp.lt.s32.totalorder %s19_s13, %s19_s13 }
   0x6   :  { %p123_p0 = scmp.ne.s32.totalorder %s19_s13, %s122_s14  ;;  %p128_p2 = scmp.lt.s32.totalorder %s122_s14, %s122_s14 }
   0x8   :  { %p129_p3 = por %p128_p2, %p127_p1 }
   0xa   :  { %p130_p4 = pnand %p129_p3, %p123_p0 }
   0xc   :  { %133 = shalt.err (!%p130_p4)
}
   0xd   :  { %s203_s15 = smov 128   ;;  %s204_s16 = smov 8  }
   0xe   :  { %24 = dma.hbm_to_vmem [thread:$0]  %s241_s0, 256, %s19_s13, [#allocation3], %s203_s15, %s203_s15, %s204_s16  }
   0xf   :  { %s205_s19 = smov [#allocation5]  }
  0x10   :  { %s30_s20 = sshll.u32 %s205_s19, 4  ;;  %s31_s20 = int_to_ptr.vmem [resolvable:$true] %s30_s20 }
  0x11   :  { %s142_s21 = scalar_lea.vmem %s31_s20, 256  ;;  %p147_p6 = scmp.lt.s32.totalorder %s31_s20, %s31_s20 }
  0x12   :  { %p143_p5 = scmp.ne.s32.totalorder %s31_s20, %s142_s21  ;;  %p148_p7 = scmp.lt.s32.totalorder %s142_s21, %s142_s21 }
  0x14   :  { %p149_p8 = por %p148_p7, %p147_p6 }
  0x16   :  { %p150_p9 = pnand %p149_p8, %p143_p5 }
  0x18   :  { %153 = shalt.err (!%p150_p9)
}
  0x19   :  { %36 = dma.hbm_to_vmem [thread:$0]  %s242_s1, 256, %s31_s20, [#allocation6], %s203_s15, %s203_s15, %s204_s16  }
  0x1a   :  { %194 = dma.done.wait [#allocation3], 256  }
  0x1b   :  { %195 = vsyncadd [#allocation3], 4294967040 }
  0x1c   :  { %196 = dma.done.wait [#allocation6], 256  }
  0x1d   :  { %197 = vsyncadd [#allocation6], 4294967040  ;;  %v206_v0 = vmov 0.0   ;;  %v49_v1 = vld [vmem:[#allocation2] sm:$0xff]  ;;  %v50_v2 = vld [vmem:[#allocation2 + $0x8] sm:$0xff]  ;;  %s207_s0 = smov [#allocation7]  }
  0x1e   :  { %47 = vst [vmem:[#allocation7] sm:$0x1] %v206_v0  ;;  %48 = vst [vmem:[#allocation8] sm:$0x1] %v206_v0  ;;  %v51_v3 = vld [vmem:[#allocation5] sm:$0xff]  ;;  %v52_v4 = vld [vmem:[#allocation5 + $0x8] sm:$0xff] }
  0x1f   :  { %v54_v5 = vmul.f32 %v51_v3, %v49_v1  ;;  %v66_v6 = vadd.f32 %v51_v3, %v49_v1  ;;  %v55_v7 = vmul.f32 %v52_v4, %v50_v2  ;;  %v67_v8 = vadd.f32 %v52_v4, %v50_v2  ;;  %s83_s1 = sshll.u32 %s207_s0, 4  ;;  %s208_s24 = smov [#allocation8]   ;;  %s84_s1 = int_to_ptr.vmem [resolvable:$true] %s83_s1 }
  0x20   :  { %s93_s25 = sshll.u32 %s208_s24, 4  ;;  %s154_s26 = scalar_lea.vmem %s84_s1, 16  ;;  %s94_s25 = int_to_ptr.vmem [resolvable:$true] %s93_s25 }
  0x21   :  { %v56_v9 = vadd.f32 %v55_v7, %v54_v5  ;;  %v68_v10 = vadd.f32 %v67_v8, %v66_v6  ;;  %p155_p10 = scmp.ne.s32.totalorder %s84_s1, %s154_s26  ;;  %s158_s27 = scalar_lea.vmem %s84_s1, 32 }
  0x22   :  { %p159_p11 = scmp.lt.s32.totalorder %s84_s1, %s84_s1  ;;  %p160_p12 = scmp.lt.s32.totalorder %s158_s27, %s154_s26 }
  0x23   :  { %v57_v11 = vrot.slane %v56_v9, 4  ;;  %v69_v12 = vrot.slane %v68_v10, 4 }
  0x24   :  { %p161_p13 = por %p160_p12, %p159_p11 }
  0x25   :  { %v58_v13 = vadd.f32 %v57_v11, %v56_v9  ;;  %v70_v14 = vadd.f32 %v69_v12, %v68_v10  ;;  %v53_v21 = vld [vmem:[#allocation7] sm:$0x1]  ;;  %v65_v22 = vld [vmem:[#allocation8] sm:$0x1] }
  0x26   :  { %p162_p0 = pnand %p161_p13, %p155_p10 }
  0x27   :  { %v59_v15 = vrot.slane %v58_v13, 2  ;;  %v71_v16 = vrot.slane %v70_v14, 2 }
  0x29   :  { %v60_v17 = vadd.f32 %v59_v15, %v58_v13  ;;  %v72_v18 = vadd.f32 %v71_v16, %v70_v14 }
  0x2b   :  { %v61_v19 = vrot.slane %v60_v17, 1  ;;  %v73_v20 = vrot.slane %v72_v18, 1 }
  0x2d   :  { %v62_v23 = vadd.f32 %v61_v19, %v60_v17  ;;  %v74_v24 = vadd.f32 %v73_v20, %v72_v18 }
  0x2f   :  { %v63_v25 = vadd.f32 %v62_v23, %v53_v21  ;;  %v75_v26 = vadd.f32 %v74_v24, %v65_v22 }
  0x31   :  { %64 = vst [vmem:[#allocation7] sm:$0x1] %v63_v25  ;;  %76 = vst [vmem:[#allocation8] sm:$0x1] %v75_v26 }
  0x32   :  { %165 = shalt.err (!%p162_p0)
}
  0x33   :  { %86 = dma.vmem_to_hbm [thread:$0]  %s84_s1, 16, %s243_s2, [#allocation4]  }
  0x34   :  { %s174_s30 = scalar_lea.vmem %s94_s25, 16  ;;  %s178_s4 = scalar_lea.vmem %s94_s25, 32 }
  0x35   :  { %p175_p1 = scmp.ne.s32.totalorder %s94_s25, %s174_s30  ;;  %p179_p2 = scmp.lt.s32.totalorder %s94_s25, %s94_s25 }
  0x36   :  { %p180_p3 = scmp.lt.s32.totalorder %s178_s4, %s174_s30 }
  0x38   :  { %p181_p4 = por %p180_p3, %p179_p2 }
  0x3a   :  { %p182_p5 = pnand %p181_p4, %p175_p1 }
  0x3c   :  { %185 = shalt.err (!%p182_p5)
}
  0x3d   :  { %96 = dma.vmem_to_hbm [thread:$0]  %s94_s25, 16, %s244_s3, [#allocation9]  }
  0x3e   :  { %198 = dma.done.wait [#allocation4], 16  }
  0x3f   :  { %199 = vsyncadd [#allocation4], 4294967280 }
  0x40   :  { %200 = dma.done.wait [#allocation9], 16  }
  0x41   :  { %201 = vsyncadd [#allocation9], 4294967280 }
  0x42   :  { %103 = vsyncpa [#allocation3], 1 }
  0x43   :  { %104 = vsyncpa [#allocation6], 1 }
  0x44   :  { %105 = vsyncpa [#allocation4], 1 }
  0x45   :  { %106 = vsyncpa [#allocation9], 1 }

</bundles_post_ra>
